<compile_context>
chip_gen: v6e
topology: v6e:2x2x1
jax: 0.10.0
libtpu: 0.0.40
codegen_flags: <defaults>
</compile_context>

<pallas_src>
import functools
import math

import jax
import jax.numpy as jnp
from jax import lax
from jax.experimental import pallas as pl
from jax.experimental.pallas import tpu as pltpu


# ---------------------------------------------------------------------------
# Generation-aware configuration helpers.
# ---------------------------------------------------------------------------

def _tpu_vmem_capacity_bytes():
    """Per-core VMEM capacity; conservative (v7x-sized) default on failure."""
    try:
        return int(pltpu.get_tpu_info().vmem_capacity_bytes)
    except Exception:
        return 64 * 1024 * 1024


def _vmem_limit_bytes():
    # ~75% of physical VMEM: ~96 MiB on v5e/v6e (128 MiB), ~48 MiB on v7x (64 MiB).
    cap = _tpu_vmem_capacity_bytes()
    return max(32 * 1024 * 1024, (cap * 3) // 4)


def _query_tile_prefs():
    """256 query rows fill the 256x256 MXUs of v6e/v7x; 128 already fills
    v5e's 4x(128x128) MXU and halves its per-step VMEM footprint."""
    prefer_256 = True
    try:
        gen = getattr(pltpu.get_tpu_info(), "chip_version", None)
        if gen is not None and "5" in str(gen):
            prefer_256 = False
    except Exception:
        pass
    return (256, 128, 64, 32, 16, 8) if prefer_256 else (128, 256, 64, 32, 16, 8)


_KV_TILE_PREFS = (512, 256, 128, 64, 32, 16, 8)
_ROW_TILE_PREFS = (512, 256, 128, 64, 32, 16, 8)


def _pick_tile(n, prefs):
    for t in prefs:
        if n % t == 0:
            return t
    return n   # full extent: always a legal block size (equals the array dim)


# ---------------------------------------------------------------------------
# Kernel 1: tiled linear projection (hoisted Q/K/V projections).
# ---------------------------------------------------------------------------

def _linear_kernel(x_ref, w_ref, b_ref, o_ref, *, scale):
    y = jnp.dot(x_ref[...], w_ref[...], preferred_element_type=jnp.float32)
    y = y + b_ref[...]
    if scale != 1.0:          # static fold of the softmax 1/sqrt(d_k) into Qp
        y = y * scale
    o_ref[...] = y.astype(o_ref.dtype)


def _linear(x, w_t, b, *, scale=1.0, vmem_limit):
    """x: (R, Din) @ w_t: (Din, Dout) + b: (1, Dout), tiled over rows."""
    R, Din = x.shape
    Dout = w_t.shape[1]
    tr = _pick_tile(R, _ROW_TILE_PREFS)
    return pl.pallas_call(
        functools.partial(_linear_kernel, scale=scale),
        out_shape=jax.ShapeDtypeStruct((R, Dout), x.dtype),
        grid=(R // tr,),
        in_specs=[pl.BlockSpec((tr, Din), lambda i: (i, 0)),
                  pl.BlockSpec((Din, Dout), lambda i: (0, 0)),   # resident weight
                  pl.BlockSpec((1, Dout), lambda i: (0, 0))],    # resident bias
        out_specs=pl.BlockSpec((tr, Dout), lambda i: (i, 0)),
        compiler_params=pltpu.CompilerParams(
            dimension_semantics=("parallel",),
            vmem_limit_bytes=vmem_limit),
    )(x, w_t, b)


# ---------------------------------------------------------------------------
# Kernel 2: flash-style multi-head attention + fused output projection.
# ---------------------------------------------------------------------------

def _flash_mha_kernel(qp_ref, kp_ref, vp_ref, wo_ref, bo_ref, o_ref,
                      m_sc, l_sc, acc_sc, *, num_heads, d_k):
    kv = pl.program_id(2)

    @pl.when(kv == 0)
    def _():
        m_sc[...] = jnp.full_like(m_sc, -jnp.inf)
        l_sc[...] = jnp.zeros_like(l_sc)
        acc_sc[...] = jnp.zeros_like(acc_sc)

    in_dtype = qp_ref.dtype
    q = qp_ref[0]            # (TQ, D); softmax scale already folded in
    k = kp_ref[0]            # (TK, D)
    v = vp_ref[0]            # (TK, D)

    # Online-softmax update, one head at a time (static loop).  Each head's
    # unnormalized P@V accumulator lives at lane offset h*d_k of acc_sc so the
    # output projection below is a single full-depth (TQ,D)@(D,D) matmul.
    for h in range(num_heads):
        lo = h * d_k
        qh = q[:, lo:lo + d_k]                                   # (TQ, d_k)
        kh = k[:, lo:lo + d_k]                                   # (TK, d_k)
        vh = v[:, lo:lo + d_k]                                   # (TK, d_k)

        s = lax.dot_general(qh, kh, (((1,), (1,)), ((), ())),
                            preferred_element_type=jnp.float32)  # (TQ, TK)

        m_prev = m_sc[:, h:h + 1]
        l_prev = l_sc[:, h:h + 1]
        m_new = jnp.maximum(m_prev, jnp.max(s, axis=-1, keepdims=True))
        alpha = jnp.exp(m_prev - m_new)
        p = jnp.exp(s - m_new)

        m_sc[:, h:h + 1] = m_new
        l_sc[:, h:h + 1] = alpha * l_prev + jnp.sum(p, axis=-1, keepdims=True)
        acc_sc[:, lo:lo + d_k] = alpha * acc_sc[:, lo:lo + d_k] + jnp.dot(
            p.astype(in_dtype), vh, preferred_element_type=jnp.float32)

    @pl.when(kv == pl.num_programs(2) - 1)
    def _():
        # Normalize each head in place (exact reciprocal; only on the last KV
        # step), then fuse all heads into one output projection with full
        # K = d_model contraction depth on the MXU.
        for h in range(num_heads):
            lo = h * d_k
            acc_sc[:, lo:lo + d_k] = acc_sc[:, lo:lo + d_k] * (
                1.0 / l_sc[:, h:h + 1])
        attn = acc_sc[...].astype(in_dtype)                      # (TQ, D)
        out = jnp.dot(attn, wo_ref[...],
                      preferred_element_type=jnp.float32) + bo_ref[...]
        o_ref[0] = out.astype(o_ref.dtype)


# ---------------------------------------------------------------------------
# Public wrapper.
# ---------------------------------------------------------------------------

def multi_head_attention(q, k, v, params, num_heads, mask=None):
    """q: (B, Sq, D); k, v: (B, Sk, D).  params = (wq, bq, wk, bk, wv, bv, wo, bo)
    with PyTorch (out_features, in_features) weight layout and (1, D) biases."""
    if mask is not None:
        # TODO(synk): additive attention mask not implemented (mask=None only).
        raise NotImplementedError("mask is not supported by this kernel")

    B, Sq, D = q.shape
    _, Sk, _ = k.shape
    assert k.shape == v.shape and k.shape[0] == B and k.shape[2] == D
    assert D % num_heads == 0
    d_k = D // num_heads
    wq, bq, wk, bk, wv, bv, wo, bo = params

    vmem_limit = _vmem_limit_bytes()

    # One-time weight transposes to (in, out) so every in-kernel dot is a plain
    # stationary-weight matmul (done once by XLA, outside any kernel).
    wq_t, wk_t, wv_t, wo_t = wq.T, wk.T, wv.T, wo.T

    # --- Hoisted projections: once per token, NOT once per query tile. ------
    scale = 1.0 / math.sqrt(d_k)
    qp = _linear(q.reshape(B * Sq, D), wq_t, bq, scale=scale,
                 vmem_limit=vmem_limit).reshape(B, Sq, D)
    kp = _linear(k.reshape(B * Sk, D), wk_t, bk,
                 vmem_limit=vmem_limit).reshape(B, Sk, D)
    vp = _linear(v.reshape(B * Sk, D), wv_t, bv,
                 vmem_limit=vmem_limit).reshape(B, Sk, D)

    # --- Flash-style attention + fused output projection. -------------------
    tq = _pick_tile(Sq, _query_tile_prefs())
    tk = _pick_tile(Sk, _KV_TILE_PREFS)
    grid = (B, Sq // tq, Sk // tk)

    kernel = functools.partial(_flash_mha_kernel, num_heads=num_heads, d_k=d_k)

    q_spec = pl.BlockSpec((1, tq, D), lambda b, i, j: (b, i, 0))
    kv_spec = pl.BlockSpec((1, tk, D), lambda b, i, j: (b, j, 0))
    wo_spec = pl.BlockSpec((D, D), lambda b, i, j: (0, 0))       # resident
    bo_spec = pl.BlockSpec((1, D), lambda b, i, j: (0, 0))       # resident
    out_spec = pl.BlockSpec((1, tq, D), lambda b, i, j: (b, i, 0))

    return pl.pallas_call(
        kernel,
        out_shape=jax.ShapeDtypeStruct((B, Sq, D), q.dtype),
        grid=grid,
        in_specs=[q_spec, kv_spec, kv_spec, wo_spec, bo_spec],
        out_specs=out_spec,
        scratch_shapes=[pltpu.VMEM((tq, num_heads), jnp.float32),   # m
                        pltpu.VMEM((tq, num_heads), jnp.float32),   # l
                        pltpu.VMEM((tq, D), jnp.float32)],          # unnorm P@V
        compiler_params=pltpu.CompilerParams(
            dimension_semantics=("parallel", "parallel", "arbitrary"),
            vmem_limit_bytes=vmem_limit),
    )(qp, kp, vp, wo_t, bo)


# ---------------------------------------------------------------------------
# Param init + pure-JAX reference (mirrors the PyTorch module, mask=None).
# ---------------------------------------------------------------------------

def init_params(key, d_model):
    """Deterministic init mimicking nn.Linear defaults (uniform +/- 1/sqrt(fan_in))."""
    bound = 1.0 / math.sqrt(d_model)
    keys = jax.random.split(key, 8)

    def w(k):
        return jax.random.uniform(k, (d_model, d_model), jnp.float32, -bound, bound)

    def b(k):
        return jax.random.uniform(k, (1, d_model), jnp.float32, -bound, bound)

    return (w(keys[0]), b(keys[1]),   # W_q, b_q
            w(keys[2]), b(keys[3]),   # W_k, b_k
            w(keys[4]), b(keys[5]),   # W_v, b_v
            w(keys[6]), b(keys[7]))   # W_o, b_o


def reference_mha(q, k, v, params, num_heads):
    wq, bq, wk, bk, wv, bv, wo, bo = params
    B, S, D = q.shape
    d_k = D // num_heads

    def proj(x, w, b):
        return x @ w.T + b

    def split(x):
        s = x.shape[1]
        return x.reshape(B, s, num_heads, d_k).transpose(0, 2, 1, 3)

    Qp, Kp, Vp = split(proj(q, wq, bq)), split(proj(k, wk, bk)), split(proj(v, wv, bv))
    scores = jnp.einsum("bhqd,bhkd->bhqk", Qp, Kp) / math.sqrt(d_k)
    probs = jax.nn.softmax(scores, axis=-1)
    attn = jnp.einsum("bhqk,bhkd->bhqd", probs, Vp)
    attn = attn.transpose(0, 2, 1, 3).reshape(B, q.shape[1], D)
    return attn @ wo.T + bo


if __name__ == "__main__":
    B, S, D, H = 2, 8, 32, 4

    key = jax.random.PRNGKey(0)
    kq, kk, kv_key, kparam = jax.random.split(key, 4)
    q = jax.random.normal(kq, (B, S, D), jnp.float32)
    k = jax.random.normal(kk, (B, S, D), jnp.float32)
    v = jax.random.normal(kv_key, (B, S, D), jnp.float32)
    params = init_params(kparam, D)

    out = multi_head_attention(q, k, v, params, H)
    out = jax.block_until_ready(out)

    ref = reference_mha(q, k, v, params, H)
    assert out.shape == (B, S, D)
    assert jnp.allclose(out, ref, atol=2e-3, rtol=2e-3), "mismatch vs JAX reference"

    print("KERNEL_OK")
</pallas_src>

<mosaic_0001>
module attributes {stable_mosaic.version = 11 : i64} {
  func.func @_linear_kernel(%arg0: i32, %arg1: memref<16x32xf32, #tpu.memory_space<vmem>>, %arg2: memref<32x32xf32, #tpu.memory_space<vmem>>, %arg3: memref<1x32xf32, #tpu.memory_space<vmem>>, %arg4: memref<16x32xf32, #tpu.memory_space<vmem>>) attributes {dimension_semantics = [#tpu.dimension_semantics<parallel>], iteration_bounds = array<i64: 1>, scalar_prefetch = 0 : i64, scratch_operands = 0 : i64, tpu.core_type = #tpu.core_type<tc>, window_params = [{transform_indices = @transform_0, window_bounds = array<i64: 16, 32>}, {pipeline_mode = #tpu.pipeline_mode<synchronous>, transform_indices = @transform_1, window_bounds = array<i64: 32, 32>}, {pipeline_mode = #tpu.pipeline_mode<synchronous>, transform_indices = @transform_2, window_bounds = array<i64: 1, 32>}, {transform_indices = @transform_3, window_bounds = array<i64: 16, 32>}]} {
    %c0 = arith.constant 0 : index
    %c0_0 = arith.constant 0 : index
    %0 = vector.load %arg1[%c0, %c0_0] : memref<16x32xf32, #tpu.memory_space<vmem>>, vector<16x32xf32>
    %c0_1 = arith.constant 0 : index
    %c0_2 = arith.constant 0 : index
    %1 = vector.load %arg2[%c0_1, %c0_2] : memref<32x32xf32, #tpu.memory_space<vmem>>, vector<32x32xf32>
    %cst = arith.constant dense<0.000000e+00> : vector<16x32xf32>
    %2 = tpu.matmul %0, %1, %cst {dimension_numbers = #tpu.dot_dimension_numbers<[1], [0], [0], [1], [0, 0, 1, 1], [], []>} : vector<16x32xf32>, vector<32x32xf32>, vector<16x32xf32> -> vector<16x32xf32>
    %c0_3 = arith.constant 0 : index
    %c0_4 = arith.constant 0 : index
    %3 = vector.load %arg3[%c0_3, %c0_4] : memref<1x32xf32, #tpu.memory_space<vmem>>, vector<1x32xf32>
    %4 = vector.broadcast %3 : vector<1x32xf32> to vector<16x32xf32>
    %5 = arith.addf %2, %4 : vector<16x32xf32>
    %cst_5 = arith.constant 0.353553385 : f32
    %6 = vector.broadcast %cst_5 : f32 to vector<16x32xf32>
    %7 = arith.mulf %5, %6 : vector<16x32xf32>
    %c0_6 = arith.constant 0 : index
    %c0_7 = arith.constant 0 : index
    %8 = vector.load %arg4[%c0_6, %c0_7] : memref<16x32xf32, #tpu.memory_space<vmem>>, vector<16x32xf32>
    tpu.vector_store %arg4[%c0_6, %c0_7], %7 {strides = array<i32>} : memref<16x32xf32, #tpu.memory_space<vmem>>, vector<16x32xf32>,
    return
  }
  func.func @transform_0(%arg0: i32) -> (i32, i32) {
    %c0_i32 = arith.constant 0 : i32
    %c0_i32_0 = arith.constant 0 : i32
    return %arg0, %c0_i32 : i32, i32
  }
  func.func @transform_1(%arg0: i32) -> (i32, i32) {
    %c0_i32 = arith.constant 0 : i32
    %c0_i32_0 = arith.constant 0 : i32
    %c0_i32_1 = arith.constant 0 : i32
    return %c0_i32, %c0_i32_0 : i32, i32
  }
  func.func @transform_2(%arg0: i32) -> (i32, i32) {
    %c0_i32 = arith.constant 0 : i32
    %c0_i32_0 = arith.constant 0 : i32
    %c0_i32_1 = arith.constant 0 : i32
    return %c0_i32, %c0_i32_0 : i32, i32
  }
  func.func @transform_3(%arg0: i32) -> (i32, i32) {
    %c0_i32 = arith.constant 0 : i32
    %c0_i32_0 = arith.constant 0 : i32
    return %arg0, %c0_i32 : i32, i32
  }
}

</mosaic_0001>

<bundles_post_ra>
// kernel: tpu_custom_call.1
= control target key start
LH: loop header
LB: loop body
LE: loop exit
PB: predicated region body
PF: predicated region fallthrough
CT: control target
= control target key end

     0   :  { %8 = vsyncpa [#allocation3], 0  ;;  %s301_s0 = inlined_call_operand.hbm [shape: f32[16,32], index: 0, kind: input, shape index: {}]   ;;  %s302_s1 = inlined_call_operand.hbm [shape: f32[32,32], index: 1, kind: input, shape index: {}]   ;;  %s303_s2 = inlined_call_operand.vmem [shape: f32[1,32], index: 2, kind: input, shape index: {}]   ;;  %s304_s3 = inlined_call_operand.hbm [shape: f32[16,32], index: 3, kind: output, shape index: {}]  }
   0x1   :  { %9 = vsyncpa [#allocation6], 0 }
   0x2   :  { %10 = vsyncpa [#allocation4], 0  ;;  %s251_s12 = smov [#allocation2]  }
   0x3   :  { %s16_s13 = sshll.u32 %s251_s12, 4  ;;  %s17_s13 = int_to_ptr.vmem [resolvable:$true] %s16_s13 }
   0x4   :  { %s193_s14 = scalar_lea.vmem %s17_s13, 256  ;;  %p198_p1 = scmp.lt.s32.totalorder %s17_s13, %s17_s13 }
   0x5   :  { %p194_p0 = scmp.ne.s32.totalorder %s17_s13, %s193_s14  ;;  %p199_p2 = scmp.lt.s32.totalorder %s193_s14, %s193_s14 }
   0x7   :  { %p200_p3 = por %p199_p2, %p198_p1 }
   0x9   :  { %p201_p4 = pnand %p200_p3, %p194_p0 }
   0xb   :  { %204 = shalt.err (!%p201_p4)
}
   0xc   :  { %s252_s15 = smov 128   ;;  %s253_s16 = smov 8  }
   0xd   :  { %22 = dma.hbm_to_vmem [thread:$0]  %s301_s0, 256, %s17_s13, [#allocation3], %s252_s15, %s252_s15, %s253_s16  }
   0xe   :  { %s254_s19 = smov [#allocation5]  }
   0xf   :  { %s28_s20 = sshll.u32 %s254_s19, 4  ;;  %s29_s20 = int_to_ptr.vmem [resolvable:$true] %s28_s20 }
  0x10   :  { %s213_s21 = scalar_lea.vmem %s29_s20, 512  ;;  %p218_p6 = scmp.lt.s32.totalorder %s29_s20, %s29_s20 }
  0x11   :  { %p214_p5 = scmp.ne.s32.totalorder %s29_s20, %s213_s21  ;;  %p219_p7 = scmp.lt.s32.totalorder %s213_s21, %s213_s21 }
  0x13   :  { %p220_p8 = por %p219_p7, %p218_p6 }
  0x15   :  { %p221_p9 = pnand %p220_p8, %p214_p5 }
  0x17   :  { %224 = shalt.err (!%p221_p9)
}
  0x18   :  { %34 = dma.hbm_to_vmem [thread:$0]  %s302_s1, 512, %s29_s20, [#allocation6], %s252_s15, %s252_s15, %s253_s16  }
  0x19   :  { %245 = dma.done.wait [#allocation3], 256  }
  0x1a   :  { %246 = vsyncadd [#allocation3], 4294967040 }
  0x1b   :  { %247 = dma.done.wait [#allocation6], 512  }
  0x1c   :  { %248 = vsyncadd [#allocation6], 4294966784  ;;  %vm56_vm0 = vcmask 261120   ;;  %v48_v0 = vld [vmem:[#allocation5 + $0x18] sm:$0xff]  ;;  %v47_v1 = vld [vmem:[#allocation5 + $0x10] sm:$0xff]  ;;  %s255_s24 = smov [#allocation7]  }
  0x1d   :  { %169 = vmatprep.subr.mxu0 %v48_v0  ;;  %v43_v2 = vld [vmem:[#allocation2] sm:$0xff]  ;;  %v46_v3 = vld [vmem:[#allocation5 + $0x8] sm:$0xff]  ;;  %v45_v4 = vld [vmem:[#allocation5] sm:$0xff]  ;;  %s147_s25 = sshll.u32 %s255_s24, 4  ;;  %s148_s25 = int_to_ptr.vmem [resolvable:$true] %s147_s25 }
  0x1e   :  { %170 = vmatpush3.msra.mxu0 %v48_v0  ;;  %177 = vmatprep.mubr.msk.f32.mxu0 %vm56_vm0, %v43_v2  ;;  %v44_v5 = vld [vmem:[#allocation2 + $0x8] sm:$0xff]  ;;  %v160_v6 = vld [vmem:[%s303_s2] ss:$0 sm:$0xff]  ;;  %s225_s26 = scalar_lea.vmem %s148_s25, 256  ;;  %p230_p11 = scmp.lt.s32.totalorder %s148_s25, %s148_s25 }
  0x1f   :  { %171 = vmatprep.subr.mxu0 %v47_v1  ;;  %p226_p10 = scmp.ne.s32.totalorder %s148_s25, %s225_s26  ;;  %p231_p12 = scmp.lt.s32.totalorder %s225_s26, %s225_s26 }
  0x20   :  { %172 = vmatpush3.msra.mxu0 %v47_v1 }
  0x21   :  { %173 = vmatprep.subr.mxu0 %v46_v3  ;;  %p232_p13 = por %p231_p12, %p230_p11 }
  0x22   :  { %174 = vmatpush3.msra.mxu0 %v46_v3 }
  0x23   :  { %175 = vmatprep.subr.mxu0 %v45_v4  ;;  %p233_p0 = pnand %p232_p13, %p226_p10 }
  0x24   :  { %176 = vmatpush3.msra.mxu0 %v45_v4 }
  0x25   :  { %178 = vmatmul.mubr.msk.f32.vlgmr.msra.gmra.mxu0 %vm56_vm0, %v44_v5 }
  0xe5   :  { %v179_v7 = vpop.f32.mrf.mxu0 }
  0xe6   :  { %v135_v8 = vadd.f32 %v179_v7, %v160_v6 }
  0xe7   :  { %v129_v9 = vpop.f32.mrf.mxu0 }
  0xe8   :  { %v139_v10 = vmul.f32 0.35355338, %v135_v8  ;;  %v130_v11 = vadd.f32 %v160_v6, %v129_v9 }
  0xea   :  { %141 = vst.msk [vmem:[#allocation7 + $0x8] sm:$0xff] %vm56_vm0, %v139_v10  ;;  %v138_v12 = vmul.f32 0.35355338, %v130_v11 }
  0xec   :  { %140 = vst.msk [vmem:[#allocation7] sm:$0xff] %vm56_vm0, %v138_v12 }
  0xed   :  { %236 = shalt.err (!%p233_p0)
}
  0xee   :  { %153 = dma.vmem_to_hbm [thread:$0]  %s148_s25, 256, %s304_s3, [#allocation4], %s252_s15, %s252_s15, %s253_s16  }
  0xef   :  { %249 = dma.done.wait [#allocation4], 256  }
  0xf0   :  { %250 = vsyncadd [#allocation4], 4294967040 }
  0xf1   :  { %157 = vsyncpa [#allocation3], 1 }
  0xf2   :  { %158 = vsyncpa [#allocation6], 1 }
  0xf3   :  { %159 = vsyncpa [#allocation4], 1 }

</bundles_post_ra>
